<compile_context>
chip_gen: v7x
topology: tpu7x:2x2x1
jax: 0.10.0
libtpu: 0.0.40
codegen_flags: <defaults>
</compile_context>

<pallas_src>
import functools

import jax
import jax.numpy as jnp
from jax.experimental import pallas as pl
from jax.experimental.pallas import tpu as pltpu


def _multitask_kernel(x_ref, cwt_ref, cb_ref, hw_ref, hb_ref, out_ref, acc_ref,
                      *, tb, cin, tc, n_chunks, inv_s):
    """Grid = (B // tb, S // ts).

    x_ref  : (tb*cin, ts) f32  -- tb batches folded into the sublane axis
    cwt_ref: (F, cin)     f32  -- synthetic backbone pointwise-conv weight (transposed)
    cb_ref : (F, 1)       f32  -- backbone bias
    hw_ref : (F, n_pad)   f32  -- fused node|area head weight (lane padded)
    hb_ref : (1, n_pad)   f32  -- fused node|area head bias
    out_ref: (tb, n_pad)  f32
    acc_ref: (tb, F, 1)   f32  -- per-batch pooled-sum accumulator (lives across S tiles)
    """
    s = pl.program_id(1)

    @pl.when(s == 0)
    def _init():
        acc_ref[...] = jnp.zeros_like(acc_ref)

    cwt = cwt_ref[...]                       # hoisted, reused for all batches/chunks
    cb = cb_ref[...]
    f = cwt.shape[0]

    for j in range(tb):                      # static unroll over sublane-packed batches
        row0 = j * cin

        def accumulate_chunk(partial, start):
            # (cin, tc) chunk of this batch's channels; stays in vregs end-to-end.
            xc = x_ref[pl.ds(row0, cin), pl.ds(start, tc)]
            h = jnp.dot(cwt, xc, preferred_element_type=jnp.float32)   # (F, tc) MXU
            h = jnp.maximum(h + cb, 0.0)                               # bias + ReLU (VPU)
            return partial + jnp.sum(h, axis=1, keepdims=True)         # lane reduce (XLU)

        zero = jnp.zeros((f, 1), jnp.float32)
        if n_chunks == 1:
            part = accumulate_chunk(zero, 0)
        else:
            part = jax.lax.fori_loop(
                0, n_chunks,
                lambda i, p: accumulate_chunk(p, pl.multiple_of(i * tc, tc)),
                zero, unroll=True)
        acc_ref[j] = acc_ref[j] + part                                 # (F, 1)

    @pl.when(s == pl.num_programs(1) - 1)
    def _epilogue():
        hw = hw_ref[...]                     # (F, n_pad)
        hb = hb_ref[...]                     # (1, n_pad)
        for j in range(tb):
            feats = acc_ref[j] * inv_s       # (F, 1) mean-pooled features
            # GEMV head: broadcast-multiply + sublane reduce -> lane-dense row.
            out_ref[j:j + 1, :] = jnp.sum(feats * hw, axis=0, keepdims=True) + hb


def _pick_tb(batch, cin):
    """Smallest batch fold so (tb*cin) fills the 8 f32 sublanes of a vreg,
    keeping the parallel batch-group grid axis as large as possible (v7x)."""
    for t in range(1, min(batch, 8) + 1):
        if batch % t == 0 and (t * cin) % 8 == 0:
            return t
    return 1


def _pick_ts(s, cap=8192):
    """Largest multiple-of-128 divisor of S, capped (>=8K buys nothing once DMA
    is at roofline; cap also bounds the double-buffered x tile on v7x VMEM)."""
    if s % 128 != 0:
        # TODO(synk): ragged S would want a masked tail tile; full-S block is
        # correct (unpipelined) and not needed for the shapes used here.
        return s
    best, t = 128, 128
    while t <= min(s, cap):
        if s % t == 0:
            best = t
        t += 128
    return best


def multitask_forward(x_nchw, params):
    """x_nchw: (B, C, H, W) float32 -> (node_out (B, Nn), area_out (B, Na))."""
    cw, cb, nw, nb, aw, ab = params
    B, C, H, W = x_nchw.shape
    S = H * W
    F = cw.shape[1]
    Nn = nw.shape[1]
    Na = aw.shape[1]
    n_pad = ((Nn + Na + 127) // 128) * 128            # lane-dense fused head width

    tb = _pick_tb(B, C)
    ts = _pick_ts(S)
    tc = 512 if ts % 512 == 0 else ts                 # in-kernel lane chunk
    n_chunks = ts // tc

    # (B, C, H, W) -> (B//tb, tb*C, S) is a pure row-major view: no wrapper cast,
    # no transpose -> x is read from HBM exactly once, as f32, sublane-packed.
    x = x_nchw.reshape(B // tb, tb * C, S)

    cwt = cw.T                                        # (F, C) backbone weight
    cb_col = cb.reshape(F, 1)                         # (F, 1) backbone bias
    # Fuse node|area heads into one lane-padded weight / bias (f32, tiny, exact).
    hw = (jnp.zeros((F, n_pad), jnp.float32)
          .at[:, :Nn].set(nw).at[:, Nn:Nn + Na].set(aw))
    hb = (jnp.zeros((1, n_pad), jnp.float32)
          .at[:, :Nn].set(nb.reshape(1, Nn)).at[:, Nn:Nn + Na].set(ab.reshape(1, Na)))

    grid = (B // tb, S // ts)
    kernel = functools.partial(_multitask_kernel, tb=tb, cin=C, tc=tc,
                               n_chunks=n_chunks, inv_s=1.0 / float(S))

    out = pl.pallas_call(
        kernel,
        # 3-D output so the (tb, n_pad) block trivially satisfies the tiling rule
        # for any B; reshaped to (B, n_pad) below (free view).
        out_shape=jax.ShapeDtypeStruct((B // tb, tb, n_pad), jnp.float32),
        grid_spec=pltpu.PrefetchScalarGridSpec(
            num_scalar_prefetch=0,
            grid=grid,
            in_specs=[
                pl.BlockSpec((pl.Squeezed(), tb * C, ts), lambda b, s: (b, 0, s)),  # x
                pl.BlockSpec((F, C), lambda b, s: (0, 0)),        # backbone weight
                pl.BlockSpec((F, 1), lambda b, s: (0, 0)),        # backbone bias
                pl.BlockSpec((F, n_pad), lambda b, s: (0, 0)),    # fused head weight
                pl.BlockSpec((1, n_pad), lambda b, s: (0, 0)),    # fused head bias
            ],
            out_specs=pl.BlockSpec((pl.Squeezed(), tb, n_pad), lambda b, s: (b, 0, 0)),
            scratch_shapes=[pltpu.VMEM((tb, F, 1), jnp.float32)],  # pooled-sum acc
        ),
        compiler_params=pltpu.CompilerParams(
            dimension_semantics=("parallel", "arbitrary"),
            vmem_limit_bytes=32 * 1024 * 1024,
        ),
    )(x, cwt, cb_col, hw, hb)

    out = out.reshape(B, n_pad)
    node_out = out[:, :Nn]
    area_out = out[:, Nn:Nn + Na]
    return node_out, area_out


def init_params(key, in_ch, num_features, num_node_classes, num_area_classes):
    k = jax.random.split(key, 6)
    cw = jax.random.normal(k[0], (in_ch, num_features), jnp.float32) * 0.1
    cb = jax.random.normal(k[1], (1, num_features), jnp.float32) * 0.01
    nw = jax.random.normal(k[2], (num_features, num_node_classes), jnp.float32) * 0.1
    nb = jax.random.normal(k[3], (1, num_node_classes), jnp.float32) * 0.01
    aw = jax.random.normal(k[4], (num_features, num_area_classes), jnp.float32) * 0.1
    ab = jax.random.normal(k[5], (1, num_area_classes), jnp.float32) * 0.01
    return (cw, cb, nw, nb, aw, ab)


def reference_forward(x_nchw, params):
    """Pure-JAX f32 reference (synthetic backbone + exact Linear heads)."""
    cw, cb, nw, nb, aw, ab = params
    B, C, H, W = x_nchw.shape
    x = x_nchw.reshape(B, C, H * W)                                  # (B, C, S)
    h = jnp.einsum("bcs,cf->bsf", x, cw,
                   precision=jax.lax.Precision.HIGHEST)              # (B, S, F)
    h = jnp.maximum(h + cb, 0.0)
    feats = jnp.mean(h, axis=1)                                      # (B, F)
    node = jnp.dot(feats, nw, precision=jax.lax.Precision.HIGHEST) + nb
    area = jnp.dot(feats, aw, precision=jax.lax.Precision.HIGHEST) + ab
    return node, area


if __name__ == "__main__":
    key = jax.random.PRNGKey(0)
    k_x1, k_x2, k_x3, k_p = jax.random.split(key, 4)

    C = 4
    num_features = 32
    num_node_classes = 8
    num_area_classes = 5
    params = init_params(k_p, C, num_features, num_node_classes, num_area_classes)

    def check(x):
        node, area = multitask_forward(x, params)
        node, area = jax.block_until_ready((node, area))
        node_ref, area_ref = reference_forward(x, params)
        assert node.shape == node_ref.shape and area.shape == area_ref.shape
        assert jnp.allclose(node, node_ref, atol=1e-3, rtol=1e-2), (
            float(jnp.max(jnp.abs(node - node_ref))))
        assert jnp.allclose(area, area_ref, atol=1e-3, rtol=1e-2), (
            float(jnp.max(jnp.abs(area - area_ref))))

    # Small shape consistent with the module spec (B=2, C=4, 16x16).
    check(jax.random.normal(k_x1, (2, C, 16, 16), jnp.float32))
    # Exercises the unrolled multi-chunk lane loop and >1 parallel batch-group.
    check(jax.random.normal(k_x2, (4, C, 32, 32), jnp.float32))
    # Exercises accumulation across multiple S tiles (S=16384 > ts cap=8192).
    check(jax.random.normal(k_x3, (2, C, 128, 128), jnp.float32))

    print("KERNEL_OK")
</pallas_src>

<mosaic_0001>
module attributes {stable_mosaic.version = 11 : i64} {
  func.func @_multitask_kernel(%arg0: i32, %arg1: i32, %arg2: memref<1x8x256xf32, #tpu.memory_space<vmem>>, %arg3: memref<32x4xf32, #tpu.memory_space<vmem>>, %arg4: memref<32x1xf32, #tpu.memory_space<vmem>>, %arg5: memref<32x128xf32, #tpu.memory_space<vmem>>, %arg6: memref<1x128xf32, #tpu.memory_space<vmem>>, %arg7: memref<1x2x128xf32, #tpu.memory_space<vmem>>, %arg8: memref<2x32x1xf32, #tpu.memory_space<vmem>>) attributes {dimension_semantics = [#tpu.dimension_semantics<parallel>, #tpu.dimension_semantics<arbitrary>], iteration_bounds = array<i64: 1, 1>, scalar_prefetch = 0 : i64, scratch_operands = 1 : i64, tpu.core_type = #tpu.core_type<tc>, window_params = [{transform_indices = @transform_0, window_bounds = array<i64: 1, 8, 256>}, {pipeline_mode = #tpu.pipeline_mode<synchronous>, transform_indices = @transform_1, window_bounds = array<i64: 32, 4>}, {pipeline_mode = #tpu.pipeline_mode<synchronous>, transform_indices = @transform_2, window_bounds = array<i64: 32, 1>}, {pipeline_mode = #tpu.pipeline_mode<synchronous>, transform_indices = @transform_3, window_bounds = array<i64: 32, 128>}, {pipeline_mode = #tpu.pipeline_mode<synchronous>, transform_indices = @transform_4, window_bounds = array<i64: 1, 128>}, {transform_indices = @transform_5, window_bounds = array<i64: 1, 2, 128>}]} {
    %c0_i32 = arith.constant 0 : i32
    %0 = arith.cmpi eq, %arg1, %c0_i32 : i32
    %1 = arith.extui %0 : i1 to i32
    %c0_i32_0 = arith.constant 0 : i32
    %2 = arith.cmpi ne, %1, %c0_i32_0 : i32
    scf.if %2 {
      %cst_29 = arith.constant 0.000000e+00 : f32
      %42 = vector.broadcast %cst_29 : f32 to vector<2x32x1xf32>
      %c0_30 = arith.constant 0 : index
      %c0_31 = arith.constant 0 : index
      %c0_32 = arith.constant 0 : index
      %43 = vector.load %arg8[%c0_30, %c0_31, %c0_32] : memref<2x32x1xf32, #tpu.memory_space<vmem>>, vector<2x32x1xf32>
      tpu.vector_store %arg8[%c0_30, %c0_31, %c0_32], %42 {strides = array<i32>} : memref<2x32x1xf32, #tpu.memory_space<vmem>>, vector<2x32x1xf32>,
    } else {
    }
    %c0 = arith.constant 0 : index
    %c0_1 = arith.constant 0 : index
    %3 = vector.load %arg3[%c0, %c0_1] : memref<32x4xf32, #tpu.memory_space<vmem>>, vector<32x4xf32>
    %c0_2 = arith.constant 0 : index
    %c0_3 = arith.constant 0 : index
    %4 = vector.load %arg4[%c0_2, %c0_3] : memref<32x1xf32, #tpu.memory_space<vmem>>, vector<32x1xf32>
    %cst = arith.constant 0.000000e+00 : f32
    %5 = vector.broadcast %cst : f32 to vector<32x1xf32>
    %c0_4 = arith.constant 0 : index
    %c0_5 = arith.constant 0 : index
    %c0_6 = arith.constant 0 : index
    %6 = vector.load %arg2[%c0_4, %c0_5, %c0_6] : memref<1x8x256xf32, #tpu.memory_space<vmem>>, vector<1x4x256xf32>
    %7 = vector.shape_cast %6 : vector<1x4x256xf32> to vector<4x256xf32>
    %cst_7 = arith.constant dense<0.000000e+00> : vector<32x256xf32>
    %8 = tpu.matmul %3, %7, %cst_7 {dimension_numbers = #tpu.dot_dimension_numbers<[1], [0], [0], [1], [0, 0, 1, 1], [], []>} : vector<32x4xf32>, vector<4x256xf32>, vector<32x256xf32> -> vector<32x256xf32>
    %9 = vector.broadcast %4 : vector<32x1xf32> to vector<32x256xf32>
    %10 = arith.addf %8, %9 : vector<32x256xf32>
    %cst_8 = arith.constant 0.000000e+00 : f32
    %11 = vector.broadcast %cst_8 : f32 to vector<32x256xf32>
    %12 = arith.maximumf %10, %11 : vector<32x256xf32>
    %cst_9 = arith.constant dense<0.000000e+00> : vector<32xf32>
    %13 = vector.multi_reduction <add>, %12, %cst_9 [1] : vector<32x256xf32> to vector<32xf32>
    %14 = vector.shape_cast %13 : vector<32xf32> to vector<32x1xf32>
    %15 = arith.addf %5, %14 : vector<32x1xf32>
    %c0_10 = arith.constant 0 : index
    %c0_11 = arith.constant 0 : index
    %c0_12 = arith.constant 0 : index
    %16 = vector.load %arg8[%c0_10, %c0_11, %c0_12] : memref<2x32x1xf32, #tpu.memory_space<vmem>>, vector<1x32x1xf32>
    %17 = vector.shape_cast %16 : vector<1x32x1xf32> to vector<32x1xf32>
    %18 = arith.addf %17, %15 : vector<32x1xf32>
    %c0_13 = arith.constant 0 : index
    %c0_14 = arith.constant 0 : index
    %c0_15 = arith.constant 0 : index
    %19 = vector.load %arg8[%c0_13, %c0_14, %c0_15] : memref<2x32x1xf32, #tpu.memory_space<vmem>>, vector<1x32x1xf32>
    %20 = vector.shape_cast %19 : vector<1x32x1xf32> to vector<32x1xf32>
    %21 = vector.shape_cast %18 : vector<32x1xf32> to vector<1x32x1xf32>
    tpu.vector_store %arg8[%c0_13, %c0_14, %c0_15], %21 {strides = array<i32>} : memref<2x32x1xf32, #tpu.memory_space<vmem>>, vector<1x32x1xf32>,
    %cst_16 = arith.constant 0.000000e+00 : f32
    %22 = vector.broadcast %cst_16 : f32 to vector<32x1xf32>
    %c0_17 = arith.constant 0 : index
    %c4 = arith.constant 4 : index
    %c0_18 = arith.constant 0 : index
    %23 = vector.load %arg2[%c0_17, %c4, %c0_18] : memref<1x8x256xf32, #tpu.memory_space<vmem>>, vector<1x4x256xf32>
    %24 = vector.shape_cast %23 : vector<1x4x256xf32> to vector<4x256xf32>
    %cst_19 = arith.constant dense<0.000000e+00> : vector<32x256xf32>
    %25 = tpu.matmul %3, %24, %cst_19 {dimension_numbers = #tpu.dot_dimension_numbers<[1], [0], [0], [1], [0, 0, 1, 1], [], []>} : vector<32x4xf32>, vector<4x256xf32>, vector<32x256xf32> -> vector<32x256xf32>
    %26 = vector.broadcast %4 : vector<32x1xf32> to vector<32x256xf32>
    %27 = arith.addf %25, %26 : vector<32x256xf32>
    %cst_20 = arith.constant 0.000000e+00 : f32
    %28 = vector.broadcast %cst_20 : f32 to vector<32x256xf32>
    %29 = arith.maximumf %27, %28 : vector<32x256xf32>
    %cst_21 = arith.constant dense<0.000000e+00> : vector<32xf32>
    %30 = vector.multi_reduction <add>, %29, %cst_21 [1] : vector<32x256xf32> to vector<32xf32>
    %31 = vector.shape_cast %30 : vector<32xf32> to vector<32x1xf32>
    %32 = arith.addf %22, %31 : vector<32x1xf32>
    %c1 = arith.constant 1 : index
    %c0_22 = arith.constant 0 : index
    %c0_23 = arith.constant 0 : index
    %33 = vector.load %arg8[%c1, %c0_22, %c0_23] : memref<2x32x1xf32, #tpu.memory_space<vmem>>, vector<1x32x1xf32>
    %34 = vector.shape_cast %33 : vector<1x32x1xf32> to vector<32x1xf32>
    %35 = arith.addf %34, %32 : vector<32x1xf32>
    %c1_24 = arith.constant 1 : index
    %c0_25 = arith.constant 0 : index
    %c0_26 = arith.constant 0 : index
    %36 = vector.load %arg8[%c1_24, %c0_25, %c0_26] : memref<2x32x1xf32, #tpu.memory_space<vmem>>, vector<1x32x1xf32>
    %37 = vector.shape_cast %36 : vector<1x32x1xf32> to vector<32x1xf32>
    %38 = vector.shape_cast %35 : vector<32x1xf32> to vector<1x32x1xf32>
    tpu.vector_store %arg8[%c1_24, %c0_25, %c0_26], %38 {strides = array<i32>} : memref<2x32x1xf32, #tpu.memory_space<vmem>>, vector<1x32x1xf32>,
    %c0_i32_27 = arith.constant 0 : i32
    %39 = arith.cmpi eq, %arg1, %c0_i32_27 : i32
    %40 = arith.extui %39 : i1 to i32
    %c0_i32_28 = arith.constant 0 : i32
    %41 = arith.cmpi ne, %40, %c0_i32_28 : i32
    scf.if %41 {
      %c0_29 = arith.constant 0 : index
      %c0_30 = arith.constant 0 : index
      %42 = vector.load %arg5[%c0_29, %c0_30] : memref<32x128xf32, #tpu.memory_space<vmem>>, vector<32x128xf32>
      %c0_31 = arith.constant 0 : index
      %c0_32 = arith.constant 0 : index
      %43 = vector.load %arg6[%c0_31, %c0_32] : memref<1x128xf32, #tpu.memory_space<vmem>>, vector<1x128xf32>
      %c0_33 = arith.constant 0 : index
      %c0_34 = arith.constant 0 : index
      %c0_35 = arith.constant 0 : index
      %44 = vector.load %arg8[%c0_33, %c0_34, %c0_35] : memref<2x32x1xf32, #tpu.memory_space<vmem>>, vector<1x32x1xf32>
      %45 = vector.shape_cast %44 : vector<1x32x1xf32> to vector<32x1xf32>
      %cst_36 = arith.constant 3.906250e-03 : f32
      %46 = vector.broadcast %cst_36 : f32 to vector<32x1xf32>
      %47 = arith.mulf %45, %46 : vector<32x1xf32>
      %48 = vector.broadcast %47 : vector<32x1xf32> to vector<32x128xf32>
      %49 = arith.mulf %48, %42 : vector<32x128xf32>
      %cst_37 = arith.constant dense<0.000000e+00> : vector<128xf32>
      %50 = vector.multi_reduction <add>, %49, %cst_37 [0] : vector<32x128xf32> to vector<128xf32>
      %51 = vector.shape_cast %50 : vector<128xf32> to vector<1x128xf32>
      %52 = arith.addf %51, %43 : vector<1x128xf32>
      %c0_38 = arith.constant 0 : index
      %c0_39 = arith.constant 0 : index
      %c0_40 = arith.constant 0 : index
      %53 = vector.load %arg7[%c0_38, %c0_39, %c0_40] : memref<1x2x128xf32, #tpu.memory_space<vmem>>, vector<1x1x128xf32>
      %54 = vector.shape_cast %53 : vector<1x1x128xf32> to vector<1x128xf32>
      %55 = vector.shape_cast %52 : vector<1x128xf32> to vector<1x1x128xf32>
      tpu.vector_store %arg7[%c0_38, %c0_39, %c0_40], %55 {strides = array<i32>} : memref<1x2x128xf32, #tpu.memory_space<vmem>>, vector<1x1x128xf32>,
      %c1_41 = arith.constant 1 : index
      %c0_42 = arith.constant 0 : index
      %c0_43 = arith.constant 0 : index
      %56 = vector.load %arg8[%c1_41, %c0_42, %c0_43] : memref<2x32x1xf32, #tpu.memory_space<vmem>>, vector<1x32x1xf32>
      %57 = vector.shape_cast %56 : vector<1x32x1xf32> to vector<32x1xf32>
      %cst_44 = arith.constant 3.906250e-03 : f32
      %58 = vector.broadcast %cst_44 : f32 to vector<32x1xf32>
      %59 = arith.mulf %57, %58 : vector<32x1xf32>
      %60 = vector.broadcast %59 : vector<32x1xf32> to vector<32x128xf32>
      %61 = arith.mulf %60, %42 : vector<32x128xf32>
      %cst_45 = arith.constant dense<0.000000e+00> : vector<128xf32>
      %62 = vector.multi_reduction <add>, %61, %cst_45 [0] : vector<32x128xf32> to vector<128xf32>
      %63 = vector.shape_cast %62 : vector<128xf32> to vector<1x128xf32>
      %64 = arith.addf %63, %43 : vector<1x128xf32>
      %c0_46 = arith.constant 0 : index
      %c1_47 = arith.constant 1 : index
      %c0_48 = arith.constant 0 : index
      %65 = vector.load %arg7[%c0_46, %c1_47, %c0_48] : memref<1x2x128xf32, #tpu.memory_space<vmem>>, vector<1x1x128xf32>
      %66 = vector.shape_cast %65 : vector<1x1x128xf32> to vector<1x128xf32>
      %67 = vector.shape_cast %64 : vector<1x128xf32> to vector<1x1x128xf32>
      tpu.vector_store %arg7[%c0_46, %c1_47, %c0_48], %67 {strides = array<i32>} : memref<1x2x128xf32, #tpu.memory_space<vmem>>, vector<1x1x128xf32>,
    } else {
    }
    return
  }
  func.func @transform_0(%arg0: i32, %arg1: i32) -> (i32, i32, i32) {
    %c0_i32 = arith.constant 0 : i32
    %c0_i32_0 = arith.constant 0 : i32
    return %arg0, %c0_i32, %arg1 : i32, i32, i32
  }
  func.func @transform_1(%arg0: i32, %arg1: i32) -> (i32, i32) {
    %c0_i32 = arith.constant 0 : i32
    %c0_i32_0 = arith.constant 0 : i32
    %c0_i32_1 = arith.constant 0 : i32
    return %c0_i32, %c0_i32_0 : i32, i32
  }
  func.func @transform_2(%arg0: i32, %arg1: i32) -> (i32, i32) {
    %c0_i32 = arith.constant 0 : i32
    %c0_i32_0 = arith.constant 0 : i32
    %c0_i32_1 = arith.constant 0 : i32
    return %c0_i32, %c0_i32_0 : i32, i32
  }
  func.func @transform_3(%arg0: i32, %arg1: i32) -> (i32, i32) {
    %c0_i32 = arith.constant 0 : i32
    %c0_i32_0 = arith.constant 0 : i32
    %c0_i32_1 = arith.constant 0 : i32
    return %c0_i32, %c0_i32_0 : i32, i32
  }
  func.func @transform_4(%arg0: i32, %arg1: i32) -> (i32, i32) {
    %c0_i32 = arith.constant 0 : i32
    %c0_i32_0 = arith.constant 0 : i32
    %c0_i32_1 = arith.constant 0 : i32
    return %c0_i32, %c0_i32_0 : i32, i32
  }
  func.func @transform_5(%arg0: i32, %arg1: i32) -> (i32, i32, i32) {
    %c0_i32 = arith.constant 0 : i32
    %c0_i32_0 = arith.constant 0 : i32
    %c0_i32_1 = arith.constant 0 : i32
    return %arg0, %c0_i32, %c0_i32_0 : i32, i32, i32
  }
}

</mosaic_0001>

<bundles_post_ra>
// kernel: tpu_custom_call.1
= control target key start
LH: loop header
LB: loop body
LE: loop exit
PB: predicated region body
PF: predicated region fallthrough
CT: control target
= control target key end

     0   :  { %vm77_vm0 = vcmask 1043456   ;;  %v495_v2 = vmov 0.0   ;;  %vm64_vm1 = vcmask 31744   ;;  %v496_v8 = vmov 0   ;;  %s635_s0 = inlined_call_operand.vmem [shape: f32[1,8,256], index: 0, kind: input, shape index: {}]   ;;  %s636_s1 = inlined_call_operand.vmem [shape: f32[32,4], index: 1, kind: input, shape index: {}]   ;;  %s637_s2 = inlined_call_operand.vmem [shape: f32[32,1], index: 2, kind: input, shape index: {}]   ;;  %s638_s3 = inlined_call_operand.vmem [shape: f32[32,128], index: 3, kind: input, shape index: {}]   ;;  %s639_s4 = inlined_call_operand.vmem [shape: f32[1,128], index: 4, kind: input, shape index: {}]   ;;  %s640_s5 = inlined_call_operand.hbm [shape: f32[1,2,128], index: 5, kind: output, shape index: {}]  }
   0x1   :  { %v43_v0 = vld [vmem:[%s635_s0 + $0x8] sm:$0xf]  ;;  %v42_v1 = vld [vmem:[%s635_s0] sm:$0xf]  ;;  %148 = vmatprep.mubr.f32.mxu0 %v495_v2  ;;  %v211_v4 = vld [vmem:[%s635_s0 + $0x8] sm:$0xf0]  ;;  %284 = vmatprep.mubr.f32.mxu1 %v495_v2 }
   0x2   :  { %454 = vmatprep.subr.msk.mxu0 %vm77_vm0, %v43_v0  ;;  %v34_v3 = vld [vmem:[%s636_s1] sm:$0xff]  ;;  %v215_v6 = vrot.slane %v211_v4, 4  ;;  %469 = vset.pattern.permute.xlu0 %v496_v8  ;;  %v35_v10 = vld [vmem:[%s636_s1 + $0x8] sm:$0xff] }
   0x3   :  { %v210_v5 = vld [vmem:[%s635_s0] sm:$0xf0]  ;;  %455 = vmatpush1.msk.msra.mxu0 %vm77_vm0, %v42_v1 }
   0x4   :  { %v214_v7 = vrot.slane %v210_v5, 4  ;;  %456 = vmatmul.mubr.msk.f32.vlgmr.msra.gmra.mrb[0].mxu0 %vm64_vm1, %v34_v3  ;;  %v38_v9 = vld [vmem:[%s637_s2] sm:$0xff]  ;;  %460 = vmatprep.subr.msk.mxu1 %vm77_vm0, %v215_v6 }
   0x5   :  { %154 = vmatprep.mubr.f32.mxu0 %v495_v2 }
   0x6   :  { %10 = vsyncpa [#allocation4], 0  ;;  %461 = vmatpush1.msk.msra.mxu1 %vm77_vm0, %v214_v7  ;;  %46 = vperm.xlu0 %469, %v38_v9   ;;  %v40_v11 = vld [vmem:[%s637_s2 + $0x10] sm:$0xff]  ;;  %v39_v12 = vld [vmem:[%s637_s2 + $0x8] sm:$0xff]  ;;  %vm25_vm2 = vcmask 7168   ;;  %s497_s23 = smov [#allocation3]  }
   0x7   :  { %462 = vmatmul.mubr.msk.f32.vlgmr.msra.gmra.mrb[0].mxu1 %vm64_vm1, %v34_v3  ;;  %470 = vset.pattern.permute.xlu1 %v496_v8  ;;  %v36_v13 = vld [vmem:[%s636_s1 + $0x10] sm:$0xff]  ;;  %v41_v14 = vld [vmem:[%s637_s2 + $0x18] sm:$0xff]  ;;  %26 = vst.msk [vmem:[#allocation2] sm:$0xff] %vm25_vm2, %v495_v2  ;;  %27 = vst.msk [vmem:[#allocation2 + $0x8] sm:$0xff] %vm25_vm2, %v495_v2  ;;  %s446_s24 = sshll.u32 %s497_s23, 4  ;;  %s447_s24 = int_to_ptr.vmem [resolvable:$true] %s446_s24 }
   0x8   :  { %457 = vmatmul.mubr.msk.f32.gmra.mrb[2].mxu0 %vm64_vm1, %v35_v10  ;;  %290 = vmatprep.mubr.f32.mxu1 %v495_v2  ;;  %v37_v15 = vld [vmem:[%s636_s1 + $0x18] sm:$0xff]  ;;  %28 = vst.msk [vmem:[#allocation2 + $0x10] sm:$0xff] %vm25_vm2, %v495_v2  ;;  %29 = vst.msk [vmem:[#allocation2 + $0x18] sm:$0xff] %vm25_vm2, %v495_v2  ;;  %s471_s25 = scalar_lea.vmem %s447_s24, 32  ;;  %p476_p1 = scmp.lt.s32.totalorder %s447_s24, %s447_s24 }
   0x9   :  { %160 = vmatprep.mubr.f32.mxu0 %v495_v2  ;;  %56 = vperm.xlu1 %470, %v40_v11   ;;  %30 = vst.msk [vmem:[#allocation2 + $0x20] sm:$0xff] %vm25_vm2, %v495_v2  ;;  %31 = vst.msk [vmem:[#allocation2 + $0x28] sm:$0xff] %vm25_vm2, %v495_v2  ;;  %p472_p0 = scmp.ne.s32.totalorder %s447_s24, %s471_s25  ;;  %p477_p2 = scmp.lt.s32.totalorder %s471_s25, %s471_s25 }
   0xa   :  { %51 = vperm.xlu0 %469, %v39_v12   ;;  %32 = vst.msk [vmem:[#allocation2 + $0x30] sm:$0xff] %vm25_vm2, %v495_v2  ;;  %33 = vst.msk [vmem:[#allocation2 + $0x38] sm:$0xff] %vm25_vm2, %v495_v2 }
   0xb   :  { %463 = vmatmul.mubr.msk.f32.gmra.mrb[2].mxu1 %vm64_vm1, %v35_v10  ;;  %p478_p3 = por %p477_p2, %p476_p1 }
   0xc   :  { %458 = vmatmul.mubr.msk.f32.gmra.mrb[4].mxu0 %vm64_vm1, %v36_v13  ;;  %296 = vmatprep.mubr.f32.mxu1 %v495_v2 }
   0xd   :  { %166 = vmatprep.mubr.f32.mxu0 %v495_v2  ;;  %61 = vperm.xlu1 %470, %v41_v14   ;;  %p479_p4 = pnand %p478_p3, %p472_p0 }
   0xf   :  { %464 = vmatmul.mubr.msk.f32.gmra.mrb[4].mxu1 %vm64_vm1, %v36_v13  ;;  %v197_v13 = vld [vmem:[#allocation2] sm:$0xff] }
  0x10   :  { %459 = vmatmul.mubr.msk.f32.gmra.mrb[6].mxu0 %vm64_vm1, %v37_v15  ;;  %302 = vmatprep.mubr.f32.mxu1 %v495_v2 }
  0x13   :  { %465 = vmatmul.mubr.msk.f32.gmra.mrb[6].mxu1 %vm64_vm1, %v37_v15 }
  0x85   :  { %v47_v16 = vpop.permute.xlu0 %46 }
  0x88   :  { %v57_v21 = vpop.permute.xlu1 %56 }
  0x89   :  { %v52_v23 = vpop.permute.xlu0 %51 }
  0x8c   :  { %v62_v49 = vpop.permute.xlu1 %61 }
  0xd7   :  { %v150_v17 = vpop.f32.mrb[0].mxu0 }
  0xd8   :  { %v151_v18 = vadd.f32 %v150_v17, %v47_v16  ;;  %v152_v19 = vpop.f32.mrb[1].mxu0  ;;  %v334_v17 = vld [vmem:[#allocation2 + $0x20] sm:$0xff] }
  0xd9   :  { %v153_v20 = vadd.f32 %v152_v19, %v47_v16 }
  0xda   :  { %v173_v22 = vmax.f32 %v151_v18, 0.0  ;;  %v286_v24 = vpop.f32.mrb[0].mxu1 }
  0xdb   :  { %v174_v25 = vmax.f32 %v153_v20, 0.0  ;;  %v287_v26 = vadd.f32 %v286_v24, %v47_v16  ;;  %v288_v27 = vpop.f32.mrb[1].mxu1  ;;  %v156_v28 = vpop.f32.mrb[2].mxu0 }
  0xdc   :  { %v289_v29 = vadd.f32 %v288_v27, %v47_v16  ;;  %v157_v30 = vadd.f32 %v156_v28, %v52_v23  ;;  %v158_v31 = vpop.f32.mrb[3].mxu0  ;;  %v198_v16 = vld [vmem:[#allocation2 + $0x8] sm:$0xff]  ;;  %v200_v27 = vld [vmem:[#allocation2 + $0x18] sm:$0xff]  ;;  %v336_v28 = vld [vmem:[#allocation2 + $0x30] sm:$0xff] }
  0xdd   :  { %v309_v32 = vmax.f32 %v287_v26, 0.0  ;;  %v159_v33 = vadd.f32 %v158_v31, %v52_v23  ;;  %v181_v34 = vadd.f32 %v174_v25, %v173_v22  ;;  %v335_v22 = vld [vmem:[#allocation2 + $0x28] sm:$0xff] }
  0xde   :  { %v310_v35 = vmax.f32 %v289_v29, 0.0  ;;  %v175_v36 = vmax.f32 %v157_v30, 0.0  ;;  %v292_v37 = vpop.f32.mrb[2].mxu1 }
  0xdf   :  { %v176_v38 = vmax.f32 %v159_v33, 0.0  ;;  %v293_v39 = vadd.f32 %v292_v37, %v52_v23  ;;  %v294_v40 = vpop.f32.mrb[3].mxu1  ;;  %v162_v41 = vpop.f32.mrb[4].mxu0  ;;  %182 = vadd.xlane.f32.xlu0 %v181_v34 }
  0xe0   :  { %v295_v42 = vadd.f32 %v294_v40, %v52_v23  ;;  %v164_v43 = vpop.f32.mrb[5].mxu0  ;;  %v317_v44 = vadd.f32 %v310_v35, %v309_v32  ;;  %v163_v45 = vadd.f32 %v162_v41, %v57_v21  ;;  %v337_v35 = vld [vmem:[#allocation2 + $0x38] sm:$0xff] }
  0xe1   :  { %v311_v46 = vmax.f32 %v293_v39, 0.0  ;;  %v165_v47 = vadd.f32 %v164_v43, %v57_v21  ;;  %v184_v48 = vadd.f32 %v176_v38, %v175_v36 }
  0xe2   :  { %v312_v50 = vmax.f32 %v295_v42, 0.0  ;;  %v298_v51 = vpop.f32.mrb[4].mxu1  ;;  %v177_v52 = vmax.f32 %v163_v45, 0.0 }
  0xe3   :  { %v178_v53 = vmax.f32 %v165_v47, 0.0  ;;  %v299_v54 = vadd.f32 %v298_v51, %v57_v21  ;;  %v168_v55 = vpop.f32.mrb[6].mxu0  ;;  %v300_v56 = vpop.f32.mrb[5].mxu1  ;;  %185 = vadd.xlane.f32.xlu1 %v184_v48  ;;  %318 = vadd.xlane.f32.xlu0 %v317_v44 }
  0xe4   :  { %v301_v57 = vadd.f32 %v300_v56, %v57_v21  ;;  %v170_v58 = vpop.f32.mrb[7].mxu0  ;;  %v320_v59 = vadd.f32 %v312_v50, %v311_v46  ;;  %v169_v60 = vadd.f32 %v168_v55, %v62_v49  ;;  %v199_v21 = vld [vmem:[#allocation2 + $0x10] sm:$0xff]  ;;  %v349_v56 = vld [vmem:[%s638_s3] sm:$0xff] }
  0xe5   :  { %v313_v61 = vmax.f32 %v299_v54, 0.0  ;;  %v171_v62 = vadd.f32 %v170_v58, %v62_v49  ;;  %v187_v63 = vadd.f32 %v178_v53, %v177_v52  ;;  %v350_v53 = vld [vmem:[%s638_s3 + $0x8] sm:$0xff] }
  0xe6   :  { %v314_v0 = vmax.f32 %v301_v57, 0.0  ;;  %v304_v1 = vpop.f32.mrb[6].mxu1  ;;  %v179_v3 = vmax.f32 %v169_v60, 0.0  ;;  %v351_v57 = vld [vmem:[%s638_s3 + $0x10] sm:$0xff] }
  0xe7   :  { %v180_v4 = vmax.f32 %v171_v62, 0.0  ;;  %v305_v5 = vadd.f32 %v304_v1, %v62_v49  ;;  %v306_v6 = vpop.f32.mrb[7].mxu1  ;;  %188 = vadd.xlane.f32.xlu1 %v187_v63  ;;  %321 = vadd.xlane.f32.xlu0 %v320_v59  ;;  %v352_v63 = vld [vmem:[%s638_s3 + $0x18] sm:$0xff] }
  0xe8   :  { %v307_v7 = vadd.f32 %v306_v6, %v62_v49  ;;  %v323_v8 = vadd.f32 %v314_v0, %v313_v61 }
  0xe9   :  { %v315_v9 = vmax.f32 %v305_v5, 0.0  ;;  %v190_v10 = vadd.f32 %v180_v4, %v179_v3 }
  0xea   :  { %v316_v11 = vmax.f32 %v307_v7, 0.0 }
  0xeb   :  { %191 = vadd.xlane.f32.xlu1 %v190_v10  ;;  %324 = vadd.xlane.f32.xlu0 %v323_v8 }
  0xec   :  { %v326_v12 = vadd.f32 %v316_v11, %v315_v9 }
  0xef   :  { %327 = vadd.xlane.f32.xlu0 %v326_v12 }
 0x16c   :  { %v183_v14 = vpop.xlane.xlu0 %182 }
 0x16d   :  { %v201_v15 = vadd.f32 %v197_v13, %v183_v14 }
 0x16f   :  { %206 = vst.msk [vmem:[#allocation2] sm:$0xff] %vm25_vm2, %v201_v15 }
 0x170   :  { %v186_v2 = vpop.xlane.xlu1 %185  ;;  %v319_v18 = vpop.xlane.xlu0 %318 }
 0x171   :  { %v202_v19 = vadd.f32 %v198_v16, %v186_v2  ;;  %v338_v20 = vadd.f32 %v334_v17, %v319_v18 }
 0x173   :  { %207 = vst.msk [vmem:[#allocation2 + $0x8] sm:$0xff] %vm25_vm2, %v202_v19  ;;  %342 = vst.msk [vmem:[#allocation2 + $0x20] sm:$0xff] %vm25_vm2, %v338_v20 }
 0x174   :  { %v189_v23 = vpop.xlane.xlu1 %188  ;;  %v322_v24 = vpop.xlane.xlu0 %321 }
 0x175   :  { %v203_v25 = vadd.f32 %v199_v21, %v189_v23  ;;  %v339_v26 = vadd.f32 %v335_v22, %v322_v24  ;;  %v353_v22 = vld [vmem:[%s639_s4] sm:$0x1] }
 0x176   :  { %v354_v29 = vld [vmem:[#allocation2] sm:$0xff] }
 0x177   :  { %208 = vst.msk [vmem:[#allocation2 + $0x10] sm:$0xff] %vm25_vm2, %v203_v25  ;;  %343 = vst.msk [vmem:[#allocation2 + $0x28] sm:$0xff] %vm25_vm2, %v339_v26  ;;  %v358_v30 = vmul.f32 0.00390625, %v354_v29 }
 0x178   :  { %v192_v31 = vpop.xlane.xlu1 %191  ;;  %v325_v32 = vpop.xlane.xlu0 %324 }
 0x179   :  { %v204_v33 = vadd.f32 %v200_v27, %v192_v31  ;;  %v340_v34 = vadd.f32 %v336_v28, %v325_v32  ;;  %364 = vperm.xlu1 %470, %v358_v30  }
 0x17a   :  { %v355_v36 = vld [vmem:[#allocation2 + $0x8] sm:$0xff]  ;;  %v397_v37 = vld [vmem:[#allocation2 + $0x20] sm:$0xff] }
 0x17b   :  { %209 = vst.msk [vmem:[#allocation2 + $0x18] sm:$0xff] %vm25_vm2, %v204_v33  ;;  %344 = vst.msk [vmem:[#allocation2 + $0x30] sm:$0xff] %vm25_vm2, %v340_v34  ;;  %v359_v38 = vmul.f32 0.00390625, %v355_v36  ;;  %v401_v39 = vmul.f32 0.00390625, %v397_v37 }
 0x17c   :  { %v328_v40 = vpop.xlane.xlu0 %327 }
 0x17d   :  { %v341_v41 = vadd.f32 %v337_v35, %v328_v40  ;;  %369 = vperm.xlu0 %469, %v359_v38   ;;  %407 = vperm.xlu1 %470, %v401_v39  }
 0x17e   :  { %v356_v42 = vld [vmem:[#allocation2 + $0x10] sm:$0xff]  ;;  %v398_v43 = vld [vmem:[#allocation2 + $0x28] sm:$0xff] }
 0x17f   :  { %345 = vst.msk [vmem:[#allocation2 + $0x38] sm:$0xff] %vm25_vm2, %v341_v41  ;;  %v360_v44 = vmul.f32 0.00390625, %v356_v42  ;;  %v402_v45 = vmul.f32 0.00390625, %v398_v43 }
 0x181   :  { %374 = vperm.xlu0 %469, %v360_v44   ;;  %412 = vperm.xlu1 %470, %v402_v45  }
 0x182   :  { %v357_v46 = vld [vmem:[#allocation2 + $0x18] sm:$0xff]  ;;  %v399_v47 = vld [vmem:[#allocation2 + $0x30] sm:$0xff] }
 0x183   :  { %v361_v48 = vmul.f32 0.00390625, %v357_v46  ;;  %v403_v49 = vmul.f32 0.00390625, %v399_v47 }
 0x185   :  { %379 = vperm.xlu0 %469, %v361_v48   ;;  %417 = vperm.xlu1 %470, %v403_v49  }
 0x186   :  { %v400_v50 = vld [vmem:[#allocation2 + $0x38] sm:$0xff] }
 0x187   :  { %v404_v51 = vmul.f32 0.00390625, %v400_v50 }
 0x189   :  { %422 = vperm.xlu1 %470, %v404_v51  }
 0x1f8   :  { %v365_v52 = vpop.permute.xlu1 %364 }
 0x1f9   :  { %v382_v61 = vmul.f32 %v365_v52, %v349_v56 }
 0x1fc   :  { %v370_v54 = vpop.permute.xlu0 %369  ;;  %v408_v55 = vpop.permute.xlu1 %407 }
 0x1fd   :  { %v383_v58 = vmul.f32 %v370_v54, %v350_v53  ;;  %v425_v5 = vmul.f32 %v408_v55, %v349_v56 }
 0x1ff   :  { %v386_v0 = vadd.f32 %v383_v58, %v382_v61 }
 0x200   :  { %v375_v59 = vpop.permute.xlu0 %374  ;;  %v413_v60 = vpop.permute.xlu1 %412 }
 0x201   :  { %v384_v62 = vmul.f32 %v375_v59, %v351_v57  ;;  %v426_v1 = vmul.f32 %v413_v60, %v350_v53 }
 0x203   :  { %v387_v6 = vadd.f32 %v386_v0, %v384_v62  ;;  %v429_v9 = vadd.f32 %v426_v1, %v425_v5 }
 0x204   :  { %v380_v3 = vpop.permute.xlu0 %379  ;;  %v418_v4 = vpop.permute.xlu1 %417 }
 0x205   :  { %v385_v7 = vmul.f32 %v380_v3, %v352_v63  ;;  %v427_v8 = vmul.f32 %v418_v4, %v351_v57 }
 0x207   :  { %v388_v10 = vadd.f32 %v387_v6, %v385_v7  ;;  %v430_v13 = vadd.f32 %v429_v9, %v427_v8 }
 0x208   :  { %v423_v11 = vpop.permute.xlu1 %422 }
 0x209   :  { %v389_v12 = vrot.slane %v388_v10, 4  ;;  %v428_v14 = vmul.f32 %v423_v11, %v352_v63 }
 0x20b   :  { %v390_v15 = vadd.f32 %v389_v12, %v388_v10  ;;  %v431_v16 = vadd.f32 %v430_v13, %v428_v14 }
 0x20d   :  { %v391_v17 = vrot.slane %v390_v15, 2  ;;  %v432_v2 = vrot.slane %v431_v16, 4 }
 0x20f   :  { %v392_v18 = vadd.f32 %v391_v17, %v390_v15  ;;  %v433_v19 = vadd.f32 %v432_v2, %v431_v16 }
 0x211   :  { %v434_v20 = vrot.slane %v433_v19, 2  ;;  %v393_v21 = vrot.slane %v392_v18, 1 }
 0x213   :  { %v435_v23 = vadd.f32 %v434_v20, %v433_v19  ;;  %v394_v24 = vadd.f32 %v393_v21, %v392_v18 }
 0x215   :  { %v395_v25 = vadd.f32 %v394_v24, %v353_v22  ;;  %v436_v26 = vrot.slane %v435_v23, 1 }
 0x217   :  { %396 = vst [vmem:[#allocation3] sm:$0x1] %v395_v25  ;;  %v437_v27 = vadd.f32 %v436_v26, %v435_v23 }
 0x219   :  { %v438_v28 = vadd.f32 %v437_v27, %v353_v22 }
 0x21b   :  { %439 = vst [vmem:[#allocation3 + $0x1] sm:$0x1] %v438_v28 }
 0x21c   :  { %482 = shalt.err (!%p479_p4)
}
 0x21d   :  { %s483_s27 = scalar_lea.hbm %s640_s5, 32 }
 0x21e   :  { %p484_p5 = scmp.ne.s32.totalorder %s640_s5, %s483_s27  ;;  %p487_p6 = scmp.lt.u32.totalorder %s483_s27, %s640_s5 }
 0x220   :  { %p489_p7 = pnand %p487_p6, %p484_p5 }
 0x222   :  { %492 = shalt.err (!%p489_p7)
}
 0x223   :  { %449 = dma.vmem_to_hbm [thread:$0]  %s447_s24, 32, %s640_s5, [#allocation4]  }
 0x224   :  { %493 = dma.done.wait [#allocation4], 32  }
 0x225   :  { %494 = vsyncadd [#allocation4], 4294967264 }
 0x226   :  { %453 = vsyncpa [#allocation4], 1 }

</bundles_post_ra>
